<compile_context>
chip_gen: v5e
topology: v5e:2x2
jax: 0.10.0
libtpu: 0.0.40
codegen_flags: <defaults>
</compile_context>

<pallas_src>
import functools

import jax
import jax.numpy as jnp
from jax.experimental import pallas as pl
from jax.experimental.pallas import tpu as pltpu


def _round_up(x, m):
    return ((x + m - 1) // m) * m


def _dense_nn_kernel(x_ref, w1_ref, b1_ref, w2_ref, b2_ref, w3_ref, b3_ref, o_ref):
    """Fused MLP forward for one block of batch rows.

    x_ref : [bn, D] f32 (natural layout)    w1_ref: [H, D] bf16   b1_ref: [H, 1] f32
    w2_ref: [H, H] bf16                      b2_ref: [H, 1] f32
    w3_ref: [H, 1] f32                       b3_ref: [1, 1] f32 (SMEM scalar)
    o_ref : [1, bn] f32
    """
    # Put the batch on the 128-wide lane axis: f32 transpose on the XLU (free slot
    # in this kernel), then cast to bf16 for the MXU.
    xT = x_ref[...].T.astype(jnp.bfloat16)                      # [D, bn]

    # fc1 + bias + ReLU   (dropout == identity in eval mode)
    h1 = jnp.dot(w1_ref[...], xT, preferred_element_type=jnp.float32)   # [H, bn]
    h1 = jnp.maximum(h1 + b1_ref[...], 0.0)

    # fc2 + bias + ReLU   (dropout == identity in eval mode)
    h2 = jnp.dot(w2_ref[...], h1.astype(jnp.bfloat16),
                 preferred_element_type=jnp.float32)                     # [H, bn]
    h2 = jnp.maximum(h2 + b2_ref[...], 0.0)

    # classifier (output dim = 1): VPU multiply + cross-sublane reduce keeps the
    # MXU slot free; result [1, bn] is a lane-dense store.
    logit = jnp.sum(h2 * w3_ref[...], axis=0, keepdims=True) + b3_ref[0, 0]
    o_ref[...] = logit.astype(o_ref.dtype)


@functools.partial(jax.jit, static_argnames=("block_n",))
def dense_nn_forward(x, params, block_n=4096):
    """Runs the fused DenseNN forward pass. x: [N, input_dim] -> logits [N]."""
    w1, b1, w2, b2, w3, b3 = params
    N, D = x.shape
    H = w1.shape[0]

    # ---- batch-tile sizing ---------------------------------------------------
    # - tiles are multiples of 128 lanes (lane-dense stores after the transpose)
    # - >=2 grid steps whenever the batch allows it, so the "parallel" grid axis
    #   can be split across both v7x TensorCores (harmless on single-TC v5e/v6e)
    # - tiles capped near block_n and sized ~evenly so batch padding stays small
    n_pad = _round_up(N, 128)
    block_n = _round_up(block_n, 128)
    min_steps = 2 if n_pad >= 2 * 128 else 1
    num_steps = max(min_steps, pl.cdiv(n_pad, block_n))
    bn = _round_up(pl.cdiv(n_pad, num_steps), 128)
    grid_n = pl.cdiv(n_pad, bn)
    Np = grid_n * bn

    # Cheap contiguous zero-pad of the batch only when N is not tile-aligned
    # (no transpose / dtype-cast relayout pass on the hot x stream).
    x_in = x if Np == N else jnp.pad(x, ((0, Np - N), (0, 0)))

    # Weights are tiny (H x D, H x H): casting them to bf16 here is negligible.
    w1b = w1.astype(jnp.bfloat16)
    w2b = w2.astype(jnp.bfloat16)

    out = pl.pallas_call(
        _dense_nn_kernel,
        out_shape=jax.ShapeDtypeStruct((1, Np), jnp.float32),
        grid_spec=pltpu.PrefetchScalarGridSpec(
            num_scalar_prefetch=0,
            grid=(grid_n,),
            in_specs=[
                pl.BlockSpec((bn, D), lambda i: (i, 0)),   # x rows (natural layout)
                pl.BlockSpec((H, D), lambda i: (0, 0)),    # w1 (resident)
                pl.BlockSpec((H, 1), lambda i: (0, 0)),    # b1
                pl.BlockSpec((H, H), lambda i: (0, 0)),    # w2 (resident)
                pl.BlockSpec((H, 1), lambda i: (0, 0)),    # b2
                pl.BlockSpec((H, 1), lambda i: (0, 0)),    # w3 (classifier weight)
                pl.BlockSpec(memory_space=pltpu.MemorySpace.SMEM),  # b3 scalar
            ],
            out_specs=pl.BlockSpec((1, bn), lambda i: (0, i)),
        ),
        compiler_params=pltpu.CompilerParams(
            dimension_semantics=("parallel",),
        ),
    )(x_in, w1b, b1, w2b, b2, w3, b3)

    # torch: logit.squeeze()  ->  [N]   (drop padded batch columns)
    return out[0, :N]


def init_dense_nn_params(key, input_dim, hdim=64):
    """Deterministic init matching torch.nn.Linear fan-in uniform init.

    Stored in kernel layout: w1 [H, D], b1 [H, 1], w2 [H, H], b2 [H, 1],
    w3 [H, 1] (classifier weight transposed), b3 [1, 1]. All float32.
    """
    k1, k2, k3, k4, k5, k6 = jax.random.split(key, 6)

    def uniform_init(k, shape, fan_in):
        bound = 1.0 / jnp.sqrt(fan_in)
        return jax.random.uniform(k, shape, jnp.float32, -bound, bound)

    w1 = uniform_init(k1, (hdim, input_dim), input_dim)
    b1 = uniform_init(k2, (hdim, 1), input_dim)
    w2 = uniform_init(k3, (hdim, hdim), hdim)
    b2 = uniform_init(k4, (hdim, 1), hdim)
    w3 = uniform_init(k5, (hdim, 1), hdim)
    b3 = uniform_init(k6, (1, 1), hdim)
    return (w1, b1, w2, b2, w3, b3)


def dense_nn_reference(x, params):
    """Pure-JAX reference mirroring the kernel's bf16-input / f32-accum precision."""
    w1, b1, w2, b2, w3, b3 = params
    xT = x.T.astype(jnp.bfloat16)
    h1 = jnp.dot(w1.astype(jnp.bfloat16), xT, preferred_element_type=jnp.float32)
    h1 = jnp.maximum(h1 + b1, 0.0)
    h2 = jnp.dot(w2.astype(jnp.bfloat16), h1.astype(jnp.bfloat16),
                 preferred_element_type=jnp.float32)
    h2 = jnp.maximum(h2 + b2, 0.0)
    return jnp.sum(h2 * w3, axis=0) + b3[0, 0]


if __name__ == "__main__":
    key = jax.random.PRNGKey(0)
    kx, kp = jax.random.split(key)

    N, INPUT_DIM, HDIM = 512, 32, 64
    x = jax.random.normal(kx, (N, INPUT_DIM), dtype=jnp.float32)
    params = init_dense_nn_params(kp, INPUT_DIM, HDIM)

    # N=512 with the default block_n -> bn=256, grid of 2 batch tiles: exercises
    # the software pipeline and gives v7x megacore two parallel iterations.
    logits = jax.block_until_ready(dense_nn_forward(x, params))
    ref = dense_nn_reference(x, params)
    assert logits.shape == (N,), logits.shape
    assert jnp.allclose(logits, ref, atol=1e-3, rtol=1e-3), "mismatch vs reference"

    # Ragged batch: exercises the zero-pad + [:N] slice path (N=300 -> Np=512).
    N2 = 300
    x2 = x[:N2]
    logits2 = jax.block_until_ready(dense_nn_forward(x2, params))
    ref2 = dense_nn_reference(x2, params)
    assert logits2.shape == (N2,), logits2.shape
    assert jnp.allclose(logits2, ref2, atol=1e-3, rtol=1e-3), "mismatch (ragged)"

    print("KERNEL_OK")
</pallas_src>

<mosaic_0001>
module attributes {stable_mosaic.version = 11 : i64} {
  func.func @_dense_nn_kernel(%arg0: i32, %arg1: memref<256x32xf32, #tpu.memory_space<vmem>>, %arg2: memref<64x32xbf16, #tpu.memory_space<vmem>>, %arg3: memref<64x1xf32, #tpu.memory_space<vmem>>, %arg4: memref<64x64xbf16, #tpu.memory_space<vmem>>, %arg5: memref<64x1xf32, #tpu.memory_space<vmem>>, %arg6: memref<64x1xf32, #tpu.memory_space<vmem>>, %arg7: memref<1x1xf32, #tpu.memory_space<smem>>, %arg8: memref<1x256xf32, #tpu.memory_space<vmem>>) attributes {dimension_semantics = [#tpu.dimension_semantics<parallel>], iteration_bounds = array<i64: 2>, scalar_prefetch = 0 : i64, scratch_operands = 0 : i64, tpu.core_type = #tpu.core_type<tc>, window_params = [{transform_indices = @transform_0, window_bounds = array<i64: 256, 32>}, {pipeline_mode = #tpu.pipeline_mode<synchronous>, transform_indices = @transform_1, window_bounds = array<i64: 64, 32>}, {pipeline_mode = #tpu.pipeline_mode<synchronous>, transform_indices = @transform_2, window_bounds = array<i64: 64, 1>}, {pipeline_mode = #tpu.pipeline_mode<synchronous>, transform_indices = @transform_3, window_bounds = array<i64: 64, 64>}, {pipeline_mode = #tpu.pipeline_mode<synchronous>, transform_indices = @transform_4, window_bounds = array<i64: 64, 1>}, {pipeline_mode = #tpu.pipeline_mode<synchronous>, transform_indices = @transform_5, window_bounds = array<i64: 64, 1>}, {transform_indices = @transform_6, window_bounds = array<i64: 1, 1>}, {transform_indices = @transform_7, window_bounds = array<i64: 1, 256>}]} {
    %c0 = arith.constant 0 : index
    %c0_0 = arith.constant 0 : index
    %0 = vector.load %arg1[%c0, %c0_0] : memref<256x32xf32, #tpu.memory_space<vmem>>, vector<256x32xf32>
    %1 = tpu.transpose %0, [1, 0] : vector<256x32xf32> -> vector<32x256xf32>
    %2 = arith.truncf %1 : vector<32x256xf32> to vector<32x256xbf16>
    %c0_1 = arith.constant 0 : index
    %c0_2 = arith.constant 0 : index
    %3 = vector.load %arg2[%c0_1, %c0_2] : memref<64x32xbf16, #tpu.memory_space<vmem>>, vector<64x32xbf16>
    %cst = arith.constant dense<0.000000e+00> : vector<64x256xf32>
    %4 = tpu.matmul %3, %2, %cst {dimension_numbers = #tpu.dot_dimension_numbers<[1], [0], [0], [1], [0, 0, 1, 1], [], []>} : vector<64x32xbf16>, vector<32x256xbf16>, vector<64x256xf32> -> vector<64x256xf32>
    %c0_3 = arith.constant 0 : index
    %c0_4 = arith.constant 0 : index
    %5 = vector.load %arg3[%c0_3, %c0_4] : memref<64x1xf32, #tpu.memory_space<vmem>>, vector<64x1xf32>
    %6 = vector.broadcast %5 : vector<64x1xf32> to vector<64x256xf32>
    %7 = arith.addf %4, %6 : vector<64x256xf32>
    %cst_5 = arith.constant 0.000000e+00 : f32
    %8 = vector.broadcast %cst_5 : f32 to vector<64x256xf32>
    %9 = arith.maximumf %7, %8 : vector<64x256xf32>
    %c0_6 = arith.constant 0 : index
    %c0_7 = arith.constant 0 : index
    %10 = vector.load %arg4[%c0_6, %c0_7] : memref<64x64xbf16, #tpu.memory_space<vmem>>, vector<64x64xbf16>
    %11 = arith.truncf %9 : vector<64x256xf32> to vector<64x256xbf16>
    %cst_8 = arith.constant dense<0.000000e+00> : vector<64x256xf32>
    %12 = tpu.matmul %10, %11, %cst_8 {dimension_numbers = #tpu.dot_dimension_numbers<[1], [0], [0], [1], [0, 0, 1, 1], [], []>} : vector<64x64xbf16>, vector<64x256xbf16>, vector<64x256xf32> -> vector<64x256xf32>
    %c0_9 = arith.constant 0 : index
    %c0_10 = arith.constant 0 : index
    %13 = vector.load %arg5[%c0_9, %c0_10] : memref<64x1xf32, #tpu.memory_space<vmem>>, vector<64x1xf32>
    %14 = vector.broadcast %13 : vector<64x1xf32> to vector<64x256xf32>
    %15 = arith.addf %12, %14 : vector<64x256xf32>
    %cst_11 = arith.constant 0.000000e+00 : f32
    %16 = vector.broadcast %cst_11 : f32 to vector<64x256xf32>
    %17 = arith.maximumf %15, %16 : vector<64x256xf32>
    %c0_12 = arith.constant 0 : index
    %c0_13 = arith.constant 0 : index
    %18 = vector.load %arg6[%c0_12, %c0_13] : memref<64x1xf32, #tpu.memory_space<vmem>>, vector<64x1xf32>
    %19 = vector.broadcast %18 : vector<64x1xf32> to vector<64x256xf32>
    %20 = arith.mulf %17, %19 : vector<64x256xf32>
    %cst_14 = arith.constant dense<0.000000e+00> : vector<256xf32>
    %21 = vector.multi_reduction <add>, %20, %cst_14 [0] : vector<64x256xf32> to vector<256xf32>
    %22 = vector.shape_cast %21 : vector<256xf32> to vector<1x256xf32>
    %c0_15 = arith.constant 0 : index
    %c0_16 = arith.constant 0 : index
    %23 = memref.load %arg7[%c0_15, %c0_16] : memref<1x1xf32, #tpu.memory_space<smem>>
    %24 = vector.broadcast %23 : f32 to vector<1x256xf32>
    %25 = arith.addf %22, %24 : vector<1x256xf32>
    %c0_17 = arith.constant 0 : index
    %c0_18 = arith.constant 0 : index
    %26 = vector.load %arg8[%c0_17, %c0_18] : memref<1x256xf32, #tpu.memory_space<vmem>>, vector<1x256xf32>
    tpu.vector_store %arg8[%c0_17, %c0_18], %25 {strides = array<i32>} : memref<1x256xf32, #tpu.memory_space<vmem>>, vector<1x256xf32>,
    return
  }
  func.func @transform_0(%arg0: i32) -> (i32, i32) {
    %c0_i32 = arith.constant 0 : i32
    %c0_i32_0 = arith.constant 0 : i32
    return %arg0, %c0_i32 : i32, i32
  }
  func.func @transform_1(%arg0: i32) -> (i32, i32) {
    %c0_i32 = arith.constant 0 : i32
    %c0_i32_0 = arith.constant 0 : i32
    %c0_i32_1 = arith.constant 0 : i32
    return %c0_i32, %c0_i32_0 : i32, i32
  }
  func.func @transform_2(%arg0: i32) -> (i32, i32) {
    %c0_i32 = arith.constant 0 : i32
    %c0_i32_0 = arith.constant 0 : i32
    %c0_i32_1 = arith.constant 0 : i32
    return %c0_i32, %c0_i32_0 : i32, i32
  }
  func.func @transform_3(%arg0: i32) -> (i32, i32) {
    %c0_i32 = arith.constant 0 : i32
    %c0_i32_0 = arith.constant 0 : i32
    %c0_i32_1 = arith.constant 0 : i32
    return %c0_i32, %c0_i32_0 : i32, i32
  }
  func.func @transform_4(%arg0: i32) -> (i32, i32) {
    %c0_i32 = arith.constant 0 : i32
    %c0_i32_0 = arith.constant 0 : i32
    %c0_i32_1 = arith.constant 0 : i32
    return %c0_i32, %c0_i32_0 : i32, i32
  }
  func.func @transform_5(%arg0: i32) -> (i32, i32) {
    %c0_i32 = arith.constant 0 : i32
    %c0_i32_0 = arith.constant 0 : i32
    %c0_i32_1 = arith.constant 0 : i32
    return %c0_i32, %c0_i32_0 : i32, i32
  }
  func.func @transform_6(%arg0: i32) -> (i32, i32) {
    %c0_i32 = arith.constant 0 : i32
    %c0_i32_0 = arith.constant 0 : i32
    %c0_i32_1 = arith.constant 0 : i32
    return %c0_i32, %c0_i32_0 : i32, i32
  }
  func.func @transform_7(%arg0: i32) -> (i32, i32) {
    %c0_i32 = arith.constant 0 : i32
    %c0_i32_0 = arith.constant 0 : i32
    return %c0_i32, %arg0 : i32, i32
  }
}

</mosaic_0001>

<bundles_post_ra>
// kernel: dense_nn_forward.1
= control target key start
LH: loop header
LB: loop body
LE: loop exit
PB: predicated region body
PF: predicated region fallthrough
CT: control target
= control target key end

     0   :  { %s1391_s0 = inlined_call_operand.vmem [shape: f32[512,32], index: 0, kind: input, shape index: {}]   ;;  %s1392_s1 = inlined_call_operand.vmem [shape: bf16[64,32], index: 1, kind: input, shape index: {}]   ;;  %s1393_s2 = inlined_call_operand.vmem [shape: f32[64,1], index: 2, kind: input, shape index: {}]   ;;  %s1394_s3 = inlined_call_operand.vmem [shape: bf16[64,64], index: 3, kind: input, shape index: {}]   ;;  %s1395_s4 = inlined_call_operand.vmem [shape: f32[64,1], index: 4, kind: input, shape index: {}]   ;;  %s1396_s5 = inlined_call_operand.vmem [shape: f32[64,1], index: 5, kind: input, shape index: {}]   ;;  %s1397_s6 = inlined_call_operand.<no memory space> [shape: f32[1,1], index: 6, kind: input, shape index: {}]   ;;  %s1398_s7 = inlined_call_operand.hbm [shape: f32[1,512], index: 7, kind: output, shape index: {}]  }
   0x1   :  { %12 = sst [smem:[#allocation2]] %s1397_s6 }
   0x2   :  { %13 = vsyncpa [#allocation4], 0 }
   0x3   :  { %15 = vsyncpa [#allocation4 + $0x1], 0  ;;  %s1166_s26 = smov 0   ;;  %s1168_s27 = smov 0  }
   0x4   :  { %s1170_s28 = smov 0   ;;  %s1172_s29 = smov 0  }
   0x5 LB: > { %s1187_s6 = sadd.s32 4294967295, %s1120_s29   ;;  %s896_s30 = sadd.s32 4294967294, %s1120_s29   ;;  %s1120_s29 = sphi %s1172_s29, %s1404_s29   ;;  %s1116_s28 = sphi %s1170_s28, %s1403_s28   ;;  %s1112_s27 = sphi %s1168_s27, %s1402_s27   ;;  %s1108_s26 = sphi %s1166_s26, %s1401_s26  }
   0x6   : > { %s1191_s8 = sadd.s32 1, %s1120_s29   ;;  %s180_s9 = sadd.s32 1, %s1116_s28 }
   0x7   : > { %s177_s10 = ssub.s32 %s1120_s29, %s1191_s8  ;;  %p190_p0 = scmp.ne.s32.totalorder %s1116_s28, %s1112_s27 }
   0x8   : > { %p178_p1 = scmp.eq.s32.totalorder %s177_s10, 0  ;;  %p191_p2 = scmp.eq.s32.totalorder %s1187_s6, 1 }
   0x9   : > { %p196_p3 = scmp.ne.s32.totalorder %s1112_s27, %s1108_s26  ;;  %p197_p4 = scmp.eq.s32.totalorder %s896_s30, 1 }
   0xa   : > { %s1202_s11 = scalar_select %p178_p1, %s1116_s28, %s180_s9  }
   0xb   : > { %p1204_p5 = por %p191_p2, %p190_p0  ;;  %p1208_p6 = por %p197_p4, %p196_p3 }
   0xc   : > { %p899_p7 = scmp.ge.s32.totalorder %s1120_s29, 1  ;;  %p242_p8 = scmp.lt.s32.totalorder %s1120_s29, 3 }
   0xe   : > { %p243_p9 = pnand %p899_p7, %p242_p8 }
   0xf   : > { %s901_s14 = sshll.u32 (!%p243_p9), %s1187_s6, 5  ;;  %s806_s23 = sld [smem:[#allocation2]] (!%p243_p9) }
  0x10   : > { %246 = sbr.rel (%p243_p9) target bundleno = 647 (0x287), region = 48  ;;  %p275_p10 = scmp.lt.s32.totalorder (!%p243_p9), %s901_s14, 63 }
  0x11   : > { %s271_s24 = sand.u32 (!%p243_p9), 1, %s1112_s27   ;;  %s952_s30 = sshll.u32 (!%p243_p9), %s1187_s6, 1 }
  0x12   : > { %s900_s25 = sshll.u32 (!%p243_p9), %s271_s24, 1  ;;  %s822_s6 = scalar_lea.sflag (!%p243_p9), [#allocation4], %s271_s24 }
  0x13   : > { %s1078_s22 = scalar_lea.hbm (!%p243_p9), %s1398_s7, 4 }
  0x15   : > { %s1406_s14 = smov (!%p275_p10, %s901_s14), 63  ;;  %v396_v48 = vld [vmem:[%s1393_s2 + $0x30] sm:$0xff]  ;;  %v1122_v49 = vmov 0   ;;  %v397_v50 = vld [vmem:[%s1393_s2 + $0x38] sm:$0xff]  ;;  %v394_v52 = vld [vmem:[%s1393_s2 + $0x20] sm:$0xff]  ;;  %vm458_vm0 = vcmask 261120  }
  0x16   : > { %s902_s15 = sshll.u32 %s1406_s14, 3  ;;  %1055 = vset.pattern.permute.xlu1 %v1122_v49  ;;  %1056 = vset.pattern.permute.xlu2 %v1122_v49  ;;  %v392_v51 = vld [vmem:[%s1393_s2 + $0x10] sm:$0xff]  ;;  %v390_v53 = vld [vmem:[%s1393_s2] sm:$0xff]  ;;  %v395_v55 = vld [vmem:[%s1393_s2 + $0x28] sm:$0xff]  ;;  %vm629_vm1 = vcmask 523264   ;;  %s832_s14 = scalar_lea.hbm %s1398_s7, %s952_s30  ;;  %vm813_vm2 = vcmask 1040384  }
  0x17   : > { %s1218_s18 = scalar_lea.vmem %s1391_s0, %s902_s15  ;;  %430 = vperm.xlu1 %1055, %v396_v48   ;;  %420 = vperm.xlu2 %1056, %v394_v52   ;;  %v561_v56 = vld [vmem:[%s1395_s4] sm:$0xff]  ;;  %v393_v57 = vld [vmem:[%s1393_s2 + $0x18] sm:$0xff]  ;;  %v563_v59 = vld [vmem:[%s1395_s4 + $0x10] sm:$0xff]  ;;  %s273_s15 = scalar_lea.vmem [#allocation3], %s900_s25 }
  0x18   : > { %v282_v0 = vld [vmem:[%s1218_s18] sm:$0xff]  ;;  %v283_v3 = vld [vmem:[%s1218_s18 + $0x8] sm:$0xff]  ;;  %v284_v6 = vld [vmem:[%s1218_s18 + $0x10] sm:$0xff]  ;;  %s834_s16 = sshll.u32 %s273_s15, 4  ;;  %s836_s17 = sshll.u32 %s832_s14, 4  ;;  %s835_s16 = int_to_ptr.vmem [resolvable:$true] %s834_s16  ;;  %s837_s17 = int_to_ptr.hbm [resolvable:$true] %s836_s17 }
  0x19   : > { %v298_v1 = vld [vmem:[%s1218_s18 + $0x80] sm:$0xff]  ;;  %v299_v4 = vld [vmem:[%s1218_s18 + $0x88] sm:$0xff]  ;;  %v300_v7 = vld [vmem:[%s1218_s18 + $0x90] sm:$0xff] }
  0x1a   : > { %v1003_v2 = vpack.i.bf16 %v282_v0, %v298_v1  ;;  %v1005_v5 = vpack.i.bf16 %v283_v3, %v299_v4  ;;  %v1007_v8 = vpack.i.bf16 %v284_v6, %v300_v7  ;;  %v285_v9 = vld [vmem:[%s1218_s18 + $0x18] sm:$0xff]  ;;  %v286_v12 = vld [vmem:[%s1218_s18 + $0x20] sm:$0xff]  ;;  %v287_v15 = vld [vmem:[%s1218_s18 + $0x28] sm:$0xff] }
  0x1b   : > { %v301_v10 = vld [vmem:[%s1218_s18 + $0x98] sm:$0xff]  ;;  %v302_v13 = vld [vmem:[%s1218_s18 + $0xa0] sm:$0xff]  ;;  %v303_v16 = vld [vmem:[%s1218_s18 + $0xa8] sm:$0xff] }
  0x1c   : > { %1004 = vxpose.xlu0.b32.start [1/16] (narrow) %v1003_v2, 32  ;;  %v1009_v11 = vpack.i.bf16 %v285_v9, %v301_v10  ;;  %v1011_v14 = vpack.i.bf16 %v286_v12, %v302_v13  ;;  %v1013_v17 = vpack.i.bf16 %v287_v15, %v303_v16  ;;  %v288_v18 = vld [vmem:[%s1218_s18 + $0x30] sm:$0xff]  ;;  %v289_v21 = vld [vmem:[%s1218_s18 + $0x38] sm:$0xff]  ;;  %v290_v24 = vld [vmem:[%s1218_s18 + $0x40] sm:$0xff] }
  0x1d   : > { %v304_v19 = vld [vmem:[%s1218_s18 + $0xb0] sm:$0xff]  ;;  %v305_v22 = vld [vmem:[%s1218_s18 + $0xb8] sm:$0xff]  ;;  %v306_v25 = vld [vmem:[%s1218_s18 + $0xc0] sm:$0xff] }
  0x1e   : > { %v1015_v20 = vpack.i.bf16 %v288_v18, %v304_v19  ;;  %v1017_v23 = vpack.i.bf16 %v289_v21, %v305_v22  ;;  %v1019_v26 = vpack.i.bf16 %v290_v24, %v306_v25  ;;  %v291_v27 = vld [vmem:[%s1218_s18 + $0x48] sm:$0xff]  ;;  %v292_v30 = vld [vmem:[%s1218_s18 + $0x50] sm:$0xff]  ;;  %v293_v33 = vld [vmem:[%s1218_s18 + $0x58] sm:$0xff] }
  0x1f   : > { %v307_v28 = vld [vmem:[%s1218_s18 + $0xc8] sm:$0xff]  ;;  %v308_v31 = vld [vmem:[%s1218_s18 + $0xd0] sm:$0xff]  ;;  %v309_v34 = vld [vmem:[%s1218_s18 + $0xd8] sm:$0xff]  ;;  %435 = vperm.xlu1 %1055, %v397_v50   ;;  %425 = vperm.xlu2 %1056, %v395_v55  }
  0x20   : > { %v1021_v29 = vpack.i.bf16 %v291_v27, %v307_v28  ;;  %v1023_v32 = vpack.i.bf16 %v292_v30, %v308_v31  ;;  %v1025_v35 = vpack.i.bf16 %v293_v33, %v309_v34  ;;  %v294_v36 = vld [vmem:[%s1218_s18 + $0x60] sm:$0xff]  ;;  %v295_v39 = vld [vmem:[%s1218_s18 + $0x68] sm:$0xff]  ;;  %v296_v42 = vld [vmem:[%s1218_s18 + $0x70] sm:$0xff] }
  0x21   : > { %v310_v37 = vld [vmem:[%s1218_s18 + $0xe0] sm:$0xff]  ;;  %v311_v40 = vld [vmem:[%s1218_s18 + $0xe8] sm:$0xff]  ;;  %v312_v43 = vld [vmem:[%s1218_s18 + $0xf0] sm:$0xff] }
  0x22   : > { %v1027_v38 = vpack.i.bf16 %v294_v36, %v310_v37  ;;  %v1029_v41 = vpack.i.bf16 %v295_v39, %v311_v40  ;;  %v1031_v44 = vpack.i.bf16 %v296_v42, %v312_v43  ;;  %v297_v45 = vld [vmem:[%s1218_s18 + $0x78] sm:$0xff]  ;;  %v391_v60 = vld [vmem:[%s1393_s2 + $0x8] sm:$0xff]  ;;  %v716_v62 = vld [vmem:[%s1396_s5] sm:$0xff] }
  0x23   : > { %v313_v46 = vld [vmem:[%s1218_s18 + $0xf8] sm:$0xff]  ;;  %v562_v63 = vld [vmem:[%s1395_s4 + $0x8] sm:$0xff]  ;;  %v565_v3 = vld [vmem:[%s1395_s4 + $0x20] sm:$0xff]  ;;  %s1072_s18 = sshra.s32 %s837_s17, 4  ;;  %s1073_s18 = int_to_ptr.hbm [resolvable:$true] %s1072_s18 }
  0x24   : > { %1006 = vxpose.xlu0.b32.cont [2/16] (narrow) %v1005_v5, 32  ;;  %v1033_v47 = vpack.i.bf16 %v297_v45, %v313_v46  ;;  %v955_v15 = vld [vmem:[%s1392_s1] sm:$0xff]  ;;  %v566_v16 = vld [vmem:[%s1395_s4 + $0x28] sm:$0xff]  ;;  %v567_v18 = vld [vmem:[%s1395_s4 + $0x30] sm:$0xff]  ;;  %s1074_s19 = scalar_lea.hbm %s1073_s18, 2  ;;  %p1079_p0 = scmp.lt.s32.totalorder %s1073_s18, %s1398_s7 }
  0x25   : > { %v718_v19 = vld [vmem:[%s1396_s5 + $0x10] sm:$0xff]  ;;  %v568_v21 = vld [vmem:[%s1395_s4 + $0x38] sm:$0xff]  ;;  %v720_v24 = vld [vmem:[%s1396_s5 + $0x20] sm:$0xff]  ;;  %p1075_p11 = scmp.ne.s32.totalorder %s1073_s18, %s1074_s19  ;;  %p1080_p1 = scmp.lt.s32.totalorder %s1078_s22, %s1074_s19 }
  0x26   : > { %v719_v22 = vld [vmem:[%s1396_s5 + $0x18] sm:$0xff]  ;;  %v957_v25 = vld [vmem:[%s1392_s1 + $0x10] sm:$0xff] }
  0x27   : > { %410 = vperm.xlu1 %1055, %v392_v51   ;;  %415 = vperm.xlu2 %1056, %v393_v57   ;;  %v723_v27 = vld [vmem:[%s1396_s5 + $0x38] sm:$0xff]  ;;  %p1076_p12 = pnand %p1075_p11, %p1204_p5  ;;  %p1081_p2 = por %p1080_p1, %p1079_p0 }
  0x28   : > { %v958_v28 = vld [vmem:[%s1392_s1 + $0x18] sm:$0xff] }
  0x29   : > { %p1077_p13 = pneg %p1076_p12 }
  0x2b   : > { %p1082_p3 = pnand %p1081_p2, %p1077_p13 }
  0x2c   : > { %1008 = vxpose.xlu0.b32.cont [3/16] (narrow) %v1007_v8, 32 }
  0x2f   : > { %400 = vperm.xlu1 %1055, %v390_v53   ;;  %405 = vperm.xlu2 %1056, %v391_v60  }
  0x34   : > { %1010 = vxpose.xlu0.b32.cont [4/16] (narrow) %v1009_v11, 32 }
  0x37   : > { %571 = vperm.xlu1 %1055, %v561_v56   ;;  %576 = vperm.xlu2 %1056, %v562_v63  }
  0x3c   : > { %1012 = vxpose.xlu0.b32.cont [5/16] (narrow) %v1011_v14, 32  ;;  %v564_v14 = vld [vmem:[%s1395_s4 + $0x18] sm:$0xff] }
  0x3f   : > { %581 = vperm.xlu1 %1055, %v563_v59   ;;  %586 = vperm.xlu2 %1056, %v564_v14  }
  0x44   : > { %1014 = vxpose.xlu0.b32.cont [6/16] (narrow) %v1013_v17, 32  ;;  %v717_v17 = vld [vmem:[%s1396_s5 + $0x8] sm:$0xff] }
  0x47   : > { %726 = vperm.xlu1 %1055, %v716_v62   ;;  %731 = vperm.xlu2 %1056, %v717_v17  }
  0x4c   : > { %1016 = vxpose.xlu0.b32.cont [7/16] (narrow) %v1015_v20, 32  ;;  %v956_v20 = vld [vmem:[%s1392_s1 + $0x8] sm:$0xff] }
  0x4f   : > { %591 = vperm.xlu1 %1055, %v565_v3   ;;  %736 = vperm.xlu2 %1056, %v718_v19  }
  0x54   : > { %1018 = vxpose.xlu0.b32.cont [8/16] (narrow) %v1017_v23, 32  ;;  %v722_v23 = vld [vmem:[%s1396_s5 + $0x30] sm:$0xff] }
  0x57   : > { %596 = vperm.xlu1 %1055, %v566_v16   ;;  %741 = vperm.xlu2 %1056, %v719_v22  }
  0x5c   : > { %1020 = vxpose.xlu0.b32.cont [9/16] (narrow) %v1019_v26, 32  ;;  %v721_v26 = vld [vmem:[%s1396_s5 + $0x28] sm:$0xff] }
  0x5f   : > { %601 = vperm.xlu1 %1055, %v567_v18   ;;  %746 = vperm.xlu2 %1056, %v720_v24  }
  0x64   : > { %1022 = vxpose.xlu0.b32.cont [10/16] (narrow) %v1021_v29, 32 }
  0x67   : > { %606 = vperm.xlu1 %1055, %v568_v21   ;;  %751 = vperm.xlu2 %1056, %v721_v26  }
  0x6c   : > { %1024 = vxpose.xlu0.b32.cont [11/16] (narrow) %v1023_v32, 32 }
  0x6f   : > { %756 = vperm.xlu1 %1055, %v722_v23   ;;  %761 = vperm.xlu2 %1056, %v723_v27  }
  0x71   : > { %v421_v39 = vpop.permute.xlu2 %420 }
  0x74   : > { %1026 = vxpose.xlu0.b32.cont [12/16] (narrow) %v1025_v35, 32 }
  0x79   : > { %v426_v43 = vpop.permute.xlu2 %425 }
  0x7c   : > { %1028 = vxpose.xlu0.b32.cont [13/16] (narrow) %v1027_v38, 32 }
  0x84   : > { %1030 = vxpose.xlu0.b32.cont [14/16] (narrow) %v1029_v41, 32 }
  0x89   : > { %v431_v40 = vpop.permute.xlu1 %430 }
  0x8c   : > { %1032 = vxpose.xlu0.b32.cont [15/16] (narrow) %v1031_v44, 32 }
  0x91   : > { %v436_v44 = vpop.permute.xlu1 %435 }
  0x94   : > { %1034 = vxpose.xlu0.b32.end [16/16] (narrow) %v1033_v47, 32  ;;  %v416_v47 = vpop.permute.xlu2 %415 }
  0x99   : > { %v411_v48 = vpop.permute.xlu1 %410 }
  0xa1   : > { %v401_v16 = vpop.permute.xlu1 %400 }
  0xc0   : > { %v1035_v54 = vpop.trf.xlu0 }
  0xc1   : > { %v1039_v10 = vunpack.i.h.bf16 %v1035_v54  ;;  %v1036_v11 = vunpack.i.l.bf16 %v1035_v54 }
  0xc8   : > { %v1040_v58 = vpop.trf.xlu0 }
  0xc9   : > { %v1044_v8 = vunpack.i.h.bf16 %v1040_v58  ;;  %v1041_v9 = vunpack.i.l.bf16 %v1040_v58 }
  0xcb   : > { %v378_v12 = vpack.c.bf16 %v1044_v8, %v1039_v10  ;;  %v379_v13 = vpack.c.bf16 %v1041_v9, %v1036_v11 }
  0xd0   : > { %v1045_v61 = vpop.trf.xlu0 }
  0xd1   : > { %v1049_v1 = vunpack.i.h.bf16 %v1045_v61  ;;  %v1046_v2 = vunpack.i.l.bf16 %v1045_v61 }
  0xd8   : > { %v1050_v0 = vpop.trf.xlu0 }
  0xd9   : > { %v1054_v4 = vunpack.i.h.bf16 %v1050_v0  ;;  %v1051_v5 = vunpack.i.l.bf16 %v1050_v0 }
  0xdb   : > { %v380_v6 = vpack.c.bf16 %v1054_v4, %v1049_v1  ;;  %v381_v7 = vpack.c.bf16 %v1051_v5, %v1046_v2  ;;  %v406_v5 = vpop.permute.xlu2 %405 }
  0xdd   : > { %477 = vmatpush.bf16.msra.mxu0 %v380_v6  ;;  %506 = vmatpush.bf16.msra.mxu1 %v381_v7 }
  0xe1   : > { %478 = vmatpush.bf16.msra.mxu0 %v378_v12  ;;  %507 = vmatpush.bf16.msra.mxu1 %v379_v13 }
  0xe4   : > { %919 = vmatmul.msk.bf16.vlgmr.msra.gmra.mxu0 %vm458_vm0, %v955_v15  ;;  %923 = vmatmul.msk.bf16.vlgmr.msra.gmra.mxu1 %vm458_vm0, %v955_v15 }
  0xf4   : > { %920 = vmatmul.msk.bf16.gmra.mxu0 %vm458_vm0, %v956_v20  ;;  %924 = vmatmul.msk.bf16.gmra.mxu1 %vm458_vm0, %v956_v20 }
  0xfb   : > { %1057 = vset.pattern.permute.xlu0 %v1122_v49 }
 0x104   : > { %921 = vmatmul.msk.bf16.gmra.mxu0 %vm458_vm0, %v957_v25  ;;  %925 = vmatmul.msk.bf16.gmra.mxu1 %vm458_vm0, %v957_v25 }
 0x114   : > { %922 = vmatmul.msk.bf16.gmra.mxu0 %vm458_vm0, %v958_v28  ;;  %926 = vmatmul.msk.bf16.gmra.mxu1 %vm458_vm0, %v958_v28 }
 0x161   : > { %v480_v29 = vpop.f32.mrf.mxu0  ;;  %v509_v30 = vpop.f32.mrf.mxu1 }
 0x162   : > { %v481_v17 = vadd.f32 %v480_v29, %v401_v16  ;;  %v510_v18 = vadd.f32 %v509_v30, %v401_v16  ;;  %v960_v29 = vld [vmem:[%s1394_s3 + $0x8] sm:$0xff]  ;;  %v961_v30 = vld [vmem:[%s1394_s3 + $0x10] sm:$0xff] }
 0x164   : > { %v529_v25 = vmax.f32 %v481_v17, 0.0  ;;  %v530_v26 = vmax.f32 %v510_v18, 0.0 }
 0x169   : > { %v482_v31 = vpop.f32.mrf.mxu0  ;;  %v511_v32 = vpop.f32.mrf.mxu1 }
 0x16a   : > { %v483_v10 = vadd.f32 %v482_v31, %v406_v5  ;;  %v512_v11 = vadd.f32 %v511_v32, %v406_v5  ;;  %v959_v31 = vld [vmem:[%s1394_s3] sm:$0xff]  ;;  %v962_v32 = vld [vmem:[%s1394_s3 + $0x18] sm:$0xff] }
 0x16c   : > { %v531_v21 = vmax.f32 %v483_v10, 0.0  ;;  %v532_v22 = vmax.f32 %v512_v11, 0.0 }
 0x16e   : > { %v553_v27 = vpack.c.bf16 %v531_v21, %v529_v25  ;;  %v554_v28 = vpack.c.bf16 %v532_v22, %v530_v26 }
 0x171   : > { %v485_v33 = vpop.f32.mrf.mxu0  ;;  %v514_v34 = vpop.f32.mrf.mxu1 }
 0x172   : > { %v486_v6 = vadd.f32 %v485_v33, %v411_v48  ;;  %v515_v7 = vadd.f32 %v514_v34, %v411_v48  ;;  %v572_v33 = vpop.permute.xlu1 %571  ;;  %v577_v34 = vpop.permute.xlu2 %576 }
 0x174   : > { %v533_v19 = vmax.f32 %v486_v6, 0.0  ;;  %v534_v20 = vmax.f32 %v515_v7, 0.0 }
 0x179   : > { %v487_v35 = vpop.f32.mrf.mxu0  ;;  %v516_v36 = vpop.f32.mrf.mxu1 }
 0x17a   : > { %v488_v63 = vadd.f32 %v487_v35, %v416_v47  ;;  %v517_v0 = vadd.f32 %v516_v36, %v416_v47  ;;  %v582_v35 = vpop.permute.xlu1 %581  ;;  %v587_v36 = vpop.permute.xlu2 %586 }
 0x17c   : > { %v535_v12 = vmax.f32 %v488_v63, 0.0  ;;  %v536_v13 = vmax.f32 %v517_v0, 0.0 }
 0x17e   : > { %v555_v23 = vpack.c.bf16 %v535_v12, %v533_v19  ;;  %v556_v24 = vpack.c.bf16 %v536_v13, %v534_v20 }
 0x181   : > { %v490_v37 = vpop.f32.mrf.mxu0  ;;  %v519_v38 = vpop.f32.mrf.mxu1 }
 0x182   : > { %v491_v57 = vadd.f32 %v490_v37, %v421_v39  ;;  %v520_v58 = vadd.f32 %v519_v38, %v421_v39  ;;  %v727_v39 = vpop.permute.xlu1 %726 }
 0x184   : > { %v537_v8 = vmax.f32 %v491_v57, 0.0  ;;  %v538_v9 = vmax.f32 %v520_v58, 0.0 }
 0x189   : > { %v492_v41 = vpop.f32.mrf.mxu0  ;;  %v521_v42 = vpop.f32.mrf.mxu1 }
 0x18a   : > { %v493_v53 = vadd.f32 %v492_v41, %v426_v43  ;;  %v522_v54 = vadd.f32 %v521_v42, %v426_v43  ;;  %v732_v42 = vpop.permute.xlu2 %731  ;;  %v592_v43 = vpop.permute.xlu1 %591 }
 0x18c   : > { %v539_v1 = vmax.f32 %v493_v53, 0.0  ;;  %v540_v2 = vmax.f32 %v522_v54, 0.0 }
 0x18e   : > { %v557_v14 = vpack.c.bf16 %v539_v1, %v537_v8  ;;  %v558_v15 = vpack.c.bf16 %v540_v2, %v538_v9 }
 0x191   : > { %v495_v45 = vpop.f32.mrf.mxu0  ;;  %v524_v46 = vpop.f32.mrf.mxu1 }
 0x192   : > { %v496_v49 = vadd.f32 %v495_v45, %v431_v40  ;;  %v525_v50 = vadd.f32 %v524_v46, %v431_v40  ;;  %v737_v46 = vpop.permute.xlu2 %736 }
 0x194   : > { %v541_v59 = vmax.f32 %v496_v49, 0.0  ;;  %v542_v60 = vmax.f32 %v525_v50, 0.0  ;;  %v597_v49 = vpop.permute.xlu1 %596 }
 0x199   : > { %v497_v51 = vpop.f32.mrf.mxu0  ;;  %v526_v52 = vpop.f32.mrf.mxu1 }
 0x19a   : > { %v498_v55 = vadd.f32 %v497_v51, %v436_v44  ;;  %v527_v56 = vadd.f32 %v526_v52, %v436_v44  ;;  %v742_v50 = vpop.permute.xlu2 %741 }
 0x19c   : > { %v543_v61 = vmax.f32 %v498_v55, 0.0  ;;  %v544_v62 = vmax.f32 %v527_v56, 0.0  ;;  %v602_v53 = vpop.permute.xlu1 %601 }
 0x19e   : > { %v559_v3 = vpack.c.bf16 %v543_v61, %v541_v59  ;;  %v560_v4 = vpack.c.bf16 %v544_v62, %v542_v60 }
 0x1a0   : > { %646 = vmatpush.bf16.msra.mxu2 %v559_v3  ;;  %675 = vmatpush.bf16.msra.mxu3 %v560_v4 }
 0x1a2   : > { %v747_v56 = vpop.permute.xlu2 %746 }
 0x1a4   : > { %647 = vmatpush.bf16.msra.mxu2 %v557_v14  ;;  %676 = vmatpush.bf16.msra.mxu3 %v558_v15  ;;  %v607_v9 = vpop.permute.xlu1 %606 }
 0x1a8   : > { %648 = vmatpush.bf16.msra.mxu2 %v555_v23  ;;  %677 = vmatpush.bf16.msra.mxu3 %v556_v24 }
 0x1aa   : > { %v752_v26 = vpop.permute.xlu2 %751 }
 0x1ac   : > { %649 = vmatpush.bf16.msra.mxu2 %v553_v27  ;;  %678 = vmatpush.bf16.msra.mxu3 %v554_v28 }
 0x1af   : > { %943 = vmatmul.msk.bf16.vlgmr.msra.gmra.mxu2 %vm629_vm1, %v959_v31  ;;  %947 = vmatmul.msk.bf16.vlgmr.msra.gmra.mxu3 %vm629_vm1, %v959_v31 }
 0x1bf   : > { %944 = vmatmul.msk.bf16.gmra.mxu2 %vm629_vm1, %v960_v29  ;;  %948 = vmatmul.msk.bf16.gmra.mxu3 %vm629_vm1, %v960_v29 }
 0x1cf   : > { %945 = vmatmul.msk.bf16.gmra.mxu2 %vm629_vm1, %v961_v30  ;;  %949 = vmatmul.msk.bf16.gmra.mxu3 %vm629_vm1, %v961_v30 }
 0x1df   : > { %946 = vmatmul.msk.bf16.gmra.mxu2 %vm629_vm1, %v962_v32  ;;  %950 = vmatmul.msk.bf16.gmra.mxu3 %vm629_vm1, %v962_v32 }
 0x232   : > { %v651_v37 = vpop.f32.mrf.mxu2  ;;  %v680_v38 = vpop.f32.mrf.mxu3 }
 0x233   : > { %v652_v57 = vadd.f32 %v651_v37, %v572_v33  ;;  %v681_v58 = vadd.f32 %v680_v38, %v572_v33 }
 0x235   : > { %v700_v3 = vmax.f32 %v652_v57, 0.0  ;;  %v701_v4 = vmax.f32 %v681_v58, 0.0 }
 0x237   : > { %v764_v14 = vmul.f32 %v727_v39, %v700_v3  ;;  %v765_v15 = vmul.f32 %v727_v39, %v701_v4 }
 0x23a   : > { %v653_v40 = vpop.f32.mrf.mxu2  ;;  %v682_v41 = vpop.f32.mrf.mxu3 }
 0x23b   : > { %v654_v54 = vadd.f32 %v653_v40, %v577_v34  ;;  %v683_v55 = vadd.f32 %v682_v41, %v577_v34  ;;  %v757_v41 = vpop.permute.xlu1 %756 }
 0x23d   : > { %v702_v63 = vmax.f32 %v654_v54, 0.0  ;;  %v703_v0 = vmax.f32 %v683_v55, 0.0 }
 0x23f   : > { %v766_v10 = vmul.f32 %v732_v42, %v702_v63  ;;  %v767_v11 = vmul.f32 %v732_v42, %v703_v0 }
 0x241   : > { %v780_v27 = vadd.f32 %v766_v10, %v764_v14  ;;  %v793_v28 = vadd.f32 %v767_v11, %v765_v15 }
 0x242   : > { %v656_v44 = vpop.f32.mrf.mxu2  ;;  %v685_v45 = vpop.f32.mrf.mxu3 }
 0x243   : > { %v657_v59 = vadd.f32 %v656_v44, %v582_v35  ;;  %v686_v60 = vadd.f32 %v685_v45, %v582_v35 }
 0x245   : > { %v704_v5 = vmax.f32 %v657_v59, 0.0  ;;  %v705_v6 = vmax.f32 %v686_v60, 0.0 }
 0x247   : > { %v768_v18 = vmul.f32 %v737_v46, %v704_v5  ;;  %v769_v19 = vmul.f32 %v737_v46, %v705_v6 }
 0x249   : > { %v781_v33 = vadd.f32 %v780_v27, %v768_v18  ;;  %v794_v34 = vadd.f32 %v793_v28, %v769_v19 }
 0x24a   : > { %v658_v47 = vpop.f32.mrf.mxu2  ;;  %v687_v48 = vpop.f32.mrf.mxu3 }
 0x24b   : > { %v659_v1 = vadd.f32 %v658_v47, %v587_v36  ;;  %v688_v2 = vadd.f32 %v687_v48, %v587_v36 }
 0x24d   : > { %v706_v12 = vmax.f32 %v659_v1, 0.0  ;;  %v707_v13 = vmax.f32 %v688_v2, 0.0 }
 0x24f   : > { %v770_v31 = vmul.f32 %v742_v50, %v706_v12  ;;  %v771_v29 = vmul.f32 %v742_v50, %v707_v13  ;;  %v816_v12 = vlaneseq }
 0x251   : > { %v782_v39 = vadd.f32 %v781_v33, %v770_v31  ;;  %v795_v40 = vadd.f32 %v794_v34, %v771_v29  ;;  %vm818_vm3 = vcmp.lt.s32.totalorder %v816_v12, 256 }
 0x252   : > { %v661_v51 = vpop.f32.mrf.mxu2  ;;  %v690_v52 = vpop.f32.mrf.mxu3 }
 0x253   : > { %v662_v7 = vadd.f32 %v661_v51, %v592_v43  ;;  %v691_v8 = vadd.f32 %v690_v52, %v592_v43 }
 0x255   : > { %v708_v20 = vmax.f32 %v662_v7, 0.0  ;;  %v709_v21 = vmax.f32 %v691_v8, 0.0 }
 0x257   : > { %v772_v35 = vmul.f32 %v747_v56, %v708_v20  ;;  %v773_v36 = vmul.f32 %v747_v56, %v709_v21  ;;  %v762_v56 = vpop.permute.xlu2 %761 }
 0x259   : > { %v783_v44 = vadd.f32 %v782_v39, %v772_v35  ;;  %v796_v45 = vadd.f32 %v795_v40, %v773_v36 }
 0x25a   : > { %v663_v61 = vpop.f32.mrf.mxu2  ;;  %v692_v62 = vpop.f32.mrf.mxu3 }
 0x25b   : > { %v664_v16 = vadd.f32 %v663_v61, %v597_v49  ;;  %v693_v17 = vadd.f32 %v692_v62, %v597_v49 }
 0x25d   : > { %v710_v30 = vmax.f32 %v664_v16, 0.0  ;;  %v711_v32 = vmax.f32 %v693_v17, 0.0 }
 0x25f   : > { %v774_v42 = vmul.f32 %v752_v26, %v710_v30  ;;  %v775_v43 = vmul.f32 %v752_v26, %v711_v32 }
 0x261   : > { %v784_v52 = vadd.f32 %v783_v44, %v774_v42 }
 0x262   : > { %v666_v22 = vpop.f32.mrf.mxu2  ;;  %v695_v23 = vpop.f32.mrf.mxu3 }
 0x263   : > { %v667_v24 = vadd.f32 %v666_v22, %v602_v53  ;;  %v696_v25 = vadd.f32 %v695_v23, %v602_v53  ;;  %v797_v53 = vadd.f32 %v796_v45, %v775_v43 }
 0x265   : > { %v712_v37 = vmax.f32 %v667_v24, 0.0  ;;  %v713_v38 = vmax.f32 %v696_v25, 0.0 }
 0x267   : > { %v776_v48 = vmul.f32 %v757_v41, %v712_v37  ;;  %v777_v49 = vmul.f32 %v757_v41, %v713_v38 }
 0x269   : > { %v785_v57 = vadd.f32 %v784_v52, %v776_v48  ;;  %v798_v58 = vadd.f32 %v797_v53, %v777_v49 }
 0x26a   : > { %v668_v46 = vpop.f32.mrf.mxu2  ;;  %v697_v47 = vpop.f32.mrf.mxu3 }
 0x26b   : > { %v669_v50 = vadd.f32 %v668_v46, %v607_v9  ;;  %v698_v51 = vadd.f32 %v697_v47, %v607_v9  ;;  %v807_v9 = vstv %s806_s23 }
 0x26d   : > { %v714_v54 = vmax.f32 %v669_v50, 0.0  ;;  %v715_v55 = vmax.f32 %v698_v51, 0.0 }
 0x26f   : > { %v778_v59 = vmul.f32 %v762_v56, %v714_v54  ;;  %v779_v60 = vmul.f32 %v762_v56, %v715_v55 }
 0x271   : > { %v786_v61 = vadd.f32 %v785_v57, %v778_v59  ;;  %v799_v62 = vadd.f32 %v798_v58, %v779_v60 }
 0x273   : > { %v787_v63 = vrot.slane %v786_v61, 4  ;;  %v800_v0 = vrot.slane %v799_v62, 4 }
 0x275   : > { %v788_v1 = vadd.f32 %v787_v63, %v786_v61  ;;  %v801_v2 = vadd.f32 %v800_v0, %v799_v62 }
 0x277   : > { %v789_v3 = vrot.slane %v788_v1, 2  ;;  %v802_v4 = vrot.slane %v801_v2, 2 }
 0x279   : > { %v790_v5 = vadd.f32 %v789_v3, %v788_v1  ;;  %v803_v6 = vadd.f32 %v802_v4, %v801_v2 }
 0x27b   : > { %v791_v7 = vrot.slane %v790_v5, 1  ;;  %v804_v8 = vrot.slane %v803_v6, 1 }
 0x27d   : > { %v792_v10 = vadd.f32 %v791_v7, %v790_v5  ;;  %v805_v11 = vadd.f32 %v804_v8, %v803_v6 }
 0x27f   : > { %v809_v13 = vadd.f32 %v807_v9, %v805_v11  ;;  %v808_v14 = vadd.f32 %v807_v9, %v792_v10 }
 0x281   : > { %v812_v15 = vrot.slane %v809_v13, 7 }
 0x283   : > { %v814_v16 = vsel %vm813_vm2, %v808_v14, %v812_v15 }
 0x284   : > { %820 = vst.msk [vmem:[%s273_s15] sm:$0x3] %vm818_vm3, %v814_v16 }
 0x285   : > { %1085 = shalt.err (!%p1082_p3)
}
 0x286   : > { %963 = dma.vmem_to_hbm [thread:$0]  (%p1204_p5), %s835_s16, 32, %s837_s17, %s822_s6  }
 0x287 PF: > { %p969_p4 = scmp.ge.s32.totalorder %s1120_s29, 2  ;;  %s848_s24 = sand.u32 1, %s1108_s26  }
 0x288   : > { %s849_s30 = scalar_lea.sflag [#allocation4], %s848_s24 }
 0x289   : > { %p966_p7 = pnand %p969_p4, %p1208_p6 }
 0x28b   : > { %p967_p8 = pneg %p966_p7 }
 0x28d   : > { %1103 = dma.done.wait (%p967_p8), %s849_s30, 32  }
 0x28e   : > { %1105 = vsyncadd (%p967_p8), %s849_s30, 4294967264  ;;  %p18_p9 = scmp.ge.s32.totalorder %s1191_s8, 4   ;;  %s1401_s26 = smov %s1112_s27 }
 0x28f   : > { %s1402_s27 = smov %s1116_s28  ;;  %s1403_s28 = smov %s1202_s11 }
 0x290   : > { %s1404_s29 = smov %s1191_s8  ;;  %20 = sbr.rel (!%p18_p9) target bundleno = 5 (0x5), region = 83 }
 0x295   :  { %855 = vsyncpa [#allocation4], 1 }
 0x296   :  { %857 = vsyncpa [#allocation4 + $0x1], 1 }

</bundles_post_ra>
